<compile_context>
chip_gen: v5e
topology: v5e:2x2
jax: 0.10.0
libtpu: 0.0.40
codegen_flags: <defaults>
</compile_context>

<pallas_src>
import functools

import jax
import jax.numpy as jnp
import numpy as np
from jax.experimental import pallas as pl
from jax.experimental.pallas import tpu as pltpu

EPS = 1e-5  # nn.BatchNorm2d default eps


def _encoding_block_kernel(x_ref, wb1_ref, g1_ref, b1_ref, wb2_ref, g2_ref,
                           b2_ref, r_ref, rt_ref, o_ref):
    """Whole block in one invocation (toy shapes; everything resident in VMEM).

    x_ref   : (N, H, W*Cin)      f32   NHWC rows, lane dim = (w, cin)
    wb1_ref : (3*W*Cin,  W*Cout) bf16  fused banded conv1 weights (dy taps in K)
    wb2_ref : (3*W*Cout, W*Cout) bf16  fused banded conv2 weights
    g*, b*  : (1, Cout)          f32   BatchNorm affine params
    r_ref   : (W*Cout, Cout)     f32   0/1 lane->channel reduction matrix
    rt_ref  : (Cout, W*Cout)     f32   its transpose (channel->lane broadcast)
    o_ref   : (N, H, W*Cout)     f32   lane-dense output (last dim = 128 here)
    """
    N, H, WCin = x_ref.shape
    WCout = o_ref.shape[-1]
    Cout = g1_ref.shape[-1]
    Wdim = WCout // Cout
    cnt = jnp.float32(N * H * Wdim)

    def im2col_h(x):
        # (N, H, K0) f32 -> (N*H, 3*K0) bf16: the three dy taps (x[h-1], x[h],
        # x[h+1], zero-padded in H) concatenated along the contraction dim so
        # the whole 3x3 conv is a single MXU matmul (the dx taps and the
        # W-direction zero padding are baked into the banded weight slab).
        n, h, k0 = x.shape
        zrow = jnp.zeros((n, 1, k0), x.dtype)
        up = jnp.concatenate([zrow, x[:, :h - 1, :]], axis=1)   # dy = 0 tap
        dn = jnp.concatenate([x[:, 1:, :], zrow], axis=1)       # dy = 2 tap
        lhs = jnp.concatenate([up, x, dn], axis=-1)             # (n, h, 3*k0)
        return lhs.reshape(n * h, 3 * k0).astype(jnp.bfloat16)

    def bn_relu(y, g_ref, b_ref):
        # Training-mode BatchNorm2d (batch stats, biased var, eps=1e-5) + ReLU
        # fused into one scale/bias FMA.  Stats + epilogue stay f32 (the conv
        # operands are bf16 but accumulation is f32).  One-pass sum/sumsq is
        # fine here: conv outputs are near zero-mean (no bias, centered weights).
        s12 = jnp.concatenate([jnp.sum(y, axis=0, keepdims=True),
                               jnp.sum(y * y, axis=0, keepdims=True)], axis=0)
        stats = jnp.dot(s12, r_ref[...],
                        preferred_element_type=jnp.float32)      # (2, Cout)
        mean = stats[0:1, :] / cnt
        var = jnp.maximum(stats[1:2, :] / cnt - mean * mean, 0.0)
        scale = g_ref[...] * jax.lax.rsqrt(var + EPS)             # (1, Cout)
        shift = b_ref[...] - mean * scale                         # (1, Cout)
        ss = jnp.dot(jnp.concatenate([scale, shift], axis=0), rt_ref[...],
                     preferred_element_type=jnp.float32)          # (2, W*Cout)
        return jnp.maximum(y * ss[0:1, :] + ss[1:2, :], 0.0)

    # ---- conv1: one bf16 MXU matmul (K = 3*W*Cin), then fused BN + ReLU ----
    y1 = bn_relu(jnp.dot(im2col_h(x_ref[...]), wb1_ref[...],
                         preferred_element_type=jnp.float32), g1_ref, b1_ref)

    # ---- conv2: one bf16 MXU matmul (K = 3*W*Cout), then fused BN + ReLU ----
    y2 = bn_relu(jnp.dot(im2col_h(y1.reshape(N, H, WCout)), wb2_ref[...],
                         preferred_element_type=jnp.float32), g2_ref, b2_ref)

    o_ref[...] = y2.reshape(N, H, WCout).astype(o_ref.dtype)


def _banded_conv_weights(w_hwio, width):
    """(3, 3, Cin, Cout) HWIO kernel -> (3*W*Cin, W*Cout) fused banded slab.

    slab[dy*W*Cin + w'*Cin + ci, w*Cout + co] = k[dy, w'-w+1, ci, co] for valid
    dx taps else 0: the dx taps and the W zero-padding are baked into the matrix
    and the dy taps are stacked along K so the in-kernel H-im2col LHS turns the
    whole 3x3 conv into a single matmul.
    # TODO(synk): O(W^2*Cin*Cout) slab with 3/W nonzero density -- for real UNet
    # widths keep a W-tile of ~128-256 lanes with a grid over W, or switch to
    # per-dx lane-shifted matmuls against dense (Cin, Cout) weights.
    """
    kh, kw, cin, cout = w_hwio.shape
    wp = jnp.arange(width)[:, None]                 # input column w'
    wo = jnp.arange(width)[None, :]                 # output column w
    dx = wp - wo + 1
    mask = ((dx >= 0) & (dx < kw)).astype(w_hwio.dtype)
    g = w_hwio[:, jnp.clip(dx, 0, kw - 1), :, :]            # (kh, W', W, Cin, Cout)
    g = g * mask[None, :, :, None, None]
    g = jnp.transpose(g, (0, 1, 3, 2, 4))                   # (kh, W', Cin, W, Cout)
    return g.reshape(kh * width * cin, width * cout)


@jax.jit
def encoding_block_forward(x_nhwc, w1, g1, b1, w2, g2, b2):
    """x_nhwc: (N, H, W, Cin) f32; w*: (3,3,Cin|Cout,Cout) HWIO. Returns NHWC.

    NHWC in/out on purpose: a UNet built from these blocks keeps the lane-packed
    NHWC layout end-to-end, so there are no per-block NCHW<->NHWC transpose
    round trips through HBM around the kernel.
    """
    N, H, W, Cin = x_nhwc.shape
    Cout = w1.shape[-1]

    x_rows = x_nhwc.reshape(N, H, W * Cin)                   # lane dim = (w, cin)
    wb1 = _banded_conv_weights(w1, W).astype(jnp.bfloat16)   # (3*W*Cin,  W*Cout)
    wb2 = _banded_conv_weights(w2, W).astype(jnp.bfloat16)   # (3*W*Cout, W*Cout)
    r = jnp.tile(jnp.eye(Cout, dtype=jnp.float32), (W, 1))   # (W*Cout, Cout)

    flops = 2 * N * H * W * Cout * (3 * W * Cin + 3 * W * Cout)
    bytes_accessed = (x_rows.size * 4 + wb1.size * 2 + wb2.size * 2
                      + (2 * Cout + W * Cout * Cout) * 2 * 4
                      + N * H * W * Cout * 4)

    vmem = functools.partial(pl.BlockSpec, memory_space=pltpu.MemorySpace.VMEM)
    # TODO(synk): for non-toy UNet shapes, grid over (N, H-row tiles) with a
    # 1-row halo and BlockSpec pipelining ("parallel" axes for megacore / v7x's
    # 2 TCs), accumulate BN sum/sumsq across tiles with pl.when init/finalize
    # (or normalize in a second cheap pass), and size tiles from
    # pltpu.get_tpu_info().vmem_capacity_bytes (64 MiB/TC on v7x).
    out = pl.pallas_call(
        _encoding_block_kernel,
        out_shape=jax.ShapeDtypeStruct((N, H, W * Cout), x_nhwc.dtype),
        in_specs=[vmem()] * 9,
        out_specs=vmem(),
        compiler_params=pltpu.CompilerParams(
            vmem_limit_bytes=32 * 1024 * 1024),
        cost_estimate=pl.CostEstimate(flops=int(flops),
                                      transcendentals=int(2 * Cout),
                                      bytes_accessed=int(bytes_accessed)),
    )(x_rows, wb1, g1.reshape(1, Cout), b1.reshape(1, Cout),
      wb2, g2.reshape(1, Cout), b2.reshape(1, Cout), r, r.T)

    return out.reshape(N, H, W, Cout)


def _reference_forward(x_nhwc, w1, g1, b1, w2, g2, b2):
    """Pure-JAX reference replicating the PyTorch forward (training-mode BN)."""
    def conv(x, w_hwio):
        return jax.lax.conv_general_dilated(
            x, w_hwio, (1, 1), ((1, 1), (1, 1)),
            dimension_numbers=("NHWC", "HWIO", "NHWC"),
            precision=jax.lax.Precision.HIGHEST)

    def bn_relu(y, g, b):
        mean = jnp.mean(y, axis=(0, 1, 2), keepdims=True)
        var = jnp.mean((y - mean) ** 2, axis=(0, 1, 2), keepdims=True)
        yn = (y - mean) * jax.lax.rsqrt(var + EPS)
        yn = yn * g.reshape(1, 1, 1, -1) + b.reshape(1, 1, 1, -1)
        return jnp.maximum(yn, 0.0)

    y = bn_relu(conv(x_nhwc, w1), g1, b1)
    return bn_relu(conv(y, w2), g2, b2)


if __name__ == "__main__":
    # Small shapes consistent with encoding_block(in_channels=4, out_channels=8).
    N, Cin, Cout, H, W = 2, 4, 8, 16, 16

    key = jax.random.PRNGKey(0)
    kx, kw1, kw2 = jax.random.split(key, 3)

    x = jax.random.normal(kx, (N, H, W, Cin), jnp.float32)   # NHWC end-to-end

    # Conv weights (Kaiming-uniform-style bounds), HWIO layout, bias=False as in
    # the PyTorch module.
    bound1 = float(np.sqrt(1.0 / (Cin * 9)))
    bound2 = float(np.sqrt(1.0 / (Cout * 9)))
    w1 = jax.random.uniform(kw1, (3, 3, Cin, Cout), jnp.float32, -bound1, bound1)
    w2 = jax.random.uniform(kw2, (3, 3, Cout, Cout), jnp.float32, -bound2, bound2)

    # BatchNorm affine params: PyTorch defaults (weight=1, bias=0).
    g1 = jnp.ones((Cout,), jnp.float32)
    b1 = jnp.zeros((Cout,), jnp.float32)
    g2 = jnp.ones((Cout,), jnp.float32)
    b2 = jnp.zeros((Cout,), jnp.float32)

    out = jax.block_until_ready(encoding_block_forward(x, w1, g1, b1, w2, g2, b2))

    ref = jax.block_until_ready(_reference_forward(x, w1, g1, b1, w2, g2, b2))
    # Tolerance sized for bf16 MXU operands (per perf review); accumulation and
    # the BN stats/epilogue are exact f32.
    np.testing.assert_allclose(np.asarray(out), np.asarray(ref),
                               rtol=5e-2, atol=5e-2)

    print("KERNEL_OK")
</pallas_src>

<mosaic_0001>
module attributes {stable_mosaic.version = 11 : i64} {
  func.func @_encoding_block_kernel(%arg0: memref<2x16x64xf32, #tpu.memory_space<vmem>>, %arg1: memref<192x128xbf16, #tpu.memory_space<vmem>>, %arg2: memref<1x8xf32, #tpu.memory_space<vmem>>, %arg3: memref<1x8xf32, #tpu.memory_space<vmem>>, %arg4: memref<384x128xbf16, #tpu.memory_space<vmem>>, %arg5: memref<1x8xf32, #tpu.memory_space<vmem>>, %arg6: memref<1x8xf32, #tpu.memory_space<vmem>>, %arg7: memref<128x8xf32, #tpu.memory_space<vmem>>, %arg8: memref<8x128xf32, #tpu.memory_space<vmem>>, %arg9: memref<2x16x128xf32, #tpu.memory_space<vmem>>) attributes {dimension_semantics = [], scalar_prefetch = 0 : i64, scratch_operands = 0 : i64, tpu.core_type = #tpu.core_type<tc>} {
    %c0 = arith.constant 0 : index
    %c0_0 = arith.constant 0 : index
    %c0_1 = arith.constant 0 : index
    %0 = vector.load %arg0[%c0, %c0_0, %c0_1] : memref<2x16x64xf32, #tpu.memory_space<vmem>>, vector<2x16x64xf32>
    %cst = arith.constant 0.000000e+00 : f32
    %1 = vector.broadcast %cst : f32 to vector<2x1x64xf32>
    %2 = vector.extract_strided_slice %0 {offsets = [0, 0, 0], sizes = [2, 15, 64], strides = [1, 1, 1]} : vector<2x16x64xf32> to vector<2x15x64xf32>
    %3 = tpu.concatenate %1, %2 in 1 : vector<2x1x64xf32>, vector<2x15x64xf32> -> vector<2x16x64xf32>
    %4 = vector.extract_strided_slice %0 {offsets = [0, 1, 0], sizes = [2, 15, 64], strides = [1, 1, 1]} : vector<2x16x64xf32> to vector<2x15x64xf32>
    %5 = tpu.concatenate %4, %1 in 1 : vector<2x15x64xf32>, vector<2x1x64xf32> -> vector<2x16x64xf32>
    %6 = tpu.concatenate %3, %0, %5 in 2 : vector<2x16x64xf32>, vector<2x16x64xf32>, vector<2x16x64xf32> -> vector<2x16x192xf32>
    %7 = vector.shape_cast %6 : vector<2x16x192xf32> to vector<32x192xf32>
    %8 = arith.truncf %7 : vector<32x192xf32> to vector<32x192xbf16>
    %c0_2 = arith.constant 0 : index
    %c0_3 = arith.constant 0 : index
    %9 = vector.load %arg1[%c0_2, %c0_3] : memref<192x128xbf16, #tpu.memory_space<vmem>>, vector<192x128xbf16>
    %cst_4 = arith.constant dense<0.000000e+00> : vector<32x128xf32>
    %10 = tpu.matmul %8, %9, %cst_4 {dimension_numbers = #tpu.dot_dimension_numbers<[1], [0], [0], [1], [0, 0, 1, 1], [], []>} : vector<32x192xbf16>, vector<192x128xbf16>, vector<32x128xf32> -> vector<32x128xf32>
    %cst_5 = arith.constant dense<0.000000e+00> : vector<128xf32>
    %11 = vector.multi_reduction <add>, %10, %cst_5 [0] : vector<32x128xf32> to vector<128xf32>
    %12 = vector.shape_cast %11 : vector<128xf32> to vector<1x128xf32>
    %13 = arith.mulf %10, %10 : vector<32x128xf32>
    %cst_6 = arith.constant dense<0.000000e+00> : vector<128xf32>
    %14 = vector.multi_reduction <add>, %13, %cst_6 [0] : vector<32x128xf32> to vector<128xf32>
    %15 = vector.shape_cast %14 : vector<128xf32> to vector<1x128xf32>
    %16 = tpu.concatenate %12, %15 in 0 : vector<1x128xf32>, vector<1x128xf32> -> vector<2x128xf32>
    %c0_7 = arith.constant 0 : index
    %c0_8 = arith.constant 0 : index
    %17 = vector.load %arg7[%c0_7, %c0_8] : memref<128x8xf32, #tpu.memory_space<vmem>>, vector<128x8xf32>
    %cst_9 = arith.constant dense<0.000000e+00> : vector<2x8xf32>
    %18 = tpu.matmul %16, %17, %cst_9 {dimension_numbers = #tpu.dot_dimension_numbers<[1], [0], [0], [1], [0, 0, 1, 1], [], []>} : vector<2x128xf32>, vector<128x8xf32>, vector<2x8xf32> -> vector<2x8xf32>
    %19 = vector.extract_strided_slice %18 {offsets = [0, 0], sizes = [1, 8], strides = [1, 1]} : vector<2x8xf32> to vector<1x8xf32>
    %cst_10 = arith.constant 5.120000e+02 : f32
    %20 = vector.broadcast %cst_10 : f32 to vector<1x8xf32>
    %21 = arith.divf %19, %20 : vector<1x8xf32>
    %22 = vector.extract_strided_slice %18 {offsets = [1, 0], sizes = [1, 8], strides = [1, 1]} : vector<2x8xf32> to vector<1x8xf32>
    %cst_11 = arith.constant 5.120000e+02 : f32
    %23 = vector.broadcast %cst_11 : f32 to vector<1x8xf32>
    %24 = arith.divf %22, %23 : vector<1x8xf32>
    %25 = arith.mulf %21, %21 : vector<1x8xf32>
    %26 = arith.subf %24, %25 : vector<1x8xf32>
    %cst_12 = arith.constant 0.000000e+00 : f32
    %27 = vector.broadcast %cst_12 : f32 to vector<1x8xf32>
    %28 = arith.maximumf %26, %27 : vector<1x8xf32>
    %c0_13 = arith.constant 0 : index
    %c0_14 = arith.constant 0 : index
    %29 = vector.load %arg2[%c0_13, %c0_14] : memref<1x8xf32, #tpu.memory_space<vmem>>, vector<1x8xf32>
    %cst_15 = arith.constant 9.99999974E-6 : f32
    %30 = vector.broadcast %cst_15 : f32 to vector<1x8xf32>
    %31 = arith.addf %28, %30 : vector<1x8xf32>
    %32 = math.rsqrt %31 : vector<1x8xf32>
    %33 = arith.mulf %29, %32 : vector<1x8xf32>
    %c0_16 = arith.constant 0 : index
    %c0_17 = arith.constant 0 : index
    %34 = vector.load %arg3[%c0_16, %c0_17] : memref<1x8xf32, #tpu.memory_space<vmem>>, vector<1x8xf32>
    %35 = arith.mulf %21, %33 : vector<1x8xf32>
    %36 = arith.subf %34, %35 : vector<1x8xf32>
    %37 = tpu.concatenate %33, %36 in 0 : vector<1x8xf32>, vector<1x8xf32> -> vector<2x8xf32>
    %c0_18 = arith.constant 0 : index
    %c0_19 = arith.constant 0 : index
    %38 = vector.load %arg8[%c0_18, %c0_19] : memref<8x128xf32, #tpu.memory_space<vmem>>, vector<8x128xf32>
    %cst_20 = arith.constant dense<0.000000e+00> : vector<2x128xf32>
    %39 = tpu.matmul %37, %38, %cst_20 {dimension_numbers = #tpu.dot_dimension_numbers<[1], [0], [0], [1], [0, 0, 1, 1], [], []>} : vector<2x8xf32>, vector<8x128xf32>, vector<2x128xf32> -> vector<2x128xf32>
    %40 = vector.extract_strided_slice %39 {offsets = [0, 0], sizes = [1, 128], strides = [1, 1]} : vector<2x128xf32> to vector<1x128xf32>
    %41 = vector.broadcast %40 : vector<1x128xf32> to vector<32x128xf32>
    %42 = arith.mulf %10, %41 : vector<32x128xf32>
    %43 = vector.extract_strided_slice %39 {offsets = [1, 0], sizes = [1, 128], strides = [1, 1]} : vector<2x128xf32> to vector<1x128xf32>
    %44 = vector.broadcast %43 : vector<1x128xf32> to vector<32x128xf32>
    %45 = arith.addf %42, %44 : vector<32x128xf32>
    %cst_21 = arith.constant 0.000000e+00 : f32
    %46 = vector.broadcast %cst_21 : f32 to vector<32x128xf32>
    %47 = arith.maximumf %45, %46 : vector<32x128xf32>
    %48 = vector.shape_cast %47 : vector<32x128xf32> to vector<2x16x128xf32>
    %cst_22 = arith.constant 0.000000e+00 : f32
    %49 = vector.broadcast %cst_22 : f32 to vector<2x1x128xf32>
    %50 = vector.extract_strided_slice %48 {offsets = [0, 0, 0], sizes = [2, 15, 128], strides = [1, 1, 1]} : vector<2x16x128xf32> to vector<2x15x128xf32>
    %51 = tpu.concatenate %49, %50 in 1 : vector<2x1x128xf32>, vector<2x15x128xf32> -> vector<2x16x128xf32>
    %52 = vector.extract_strided_slice %48 {offsets = [0, 1, 0], sizes = [2, 15, 128], strides = [1, 1, 1]} : vector<2x16x128xf32> to vector<2x15x128xf32>
    %53 = tpu.concatenate %52, %49 in 1 : vector<2x15x128xf32>, vector<2x1x128xf32> -> vector<2x16x128xf32>
    %54 = tpu.concatenate %51, %48, %53 in 2 : vector<2x16x128xf32>, vector<2x16x128xf32>, vector<2x16x128xf32> -> vector<2x16x384xf32>
    %55 = vector.shape_cast %54 : vector<2x16x384xf32> to vector<32x384xf32>
    %56 = arith.truncf %55 : vector<32x384xf32> to vector<32x384xbf16>
    %c0_23 = arith.constant 0 : index
    %c0_24 = arith.constant 0 : index
    %57 = vector.load %arg4[%c0_23, %c0_24] : memref<384x128xbf16, #tpu.memory_space<vmem>>, vector<384x128xbf16>
    %cst_25 = arith.constant dense<0.000000e+00> : vector<32x128xf32>
    %58 = tpu.matmul %56, %57, %cst_25 {dimension_numbers = #tpu.dot_dimension_numbers<[1], [0], [0], [1], [0, 0, 1, 1], [], []>} : vector<32x384xbf16>, vector<384x128xbf16>, vector<32x128xf32> -> vector<32x128xf32>
    %cst_26 = arith.constant dense<0.000000e+00> : vector<128xf32>
    %59 = vector.multi_reduction <add>, %58, %cst_26 [0] : vector<32x128xf32> to vector<128xf32>
    %60 = vector.shape_cast %59 : vector<128xf32> to vector<1x128xf32>
    %61 = arith.mulf %58, %58 : vector<32x128xf32>
    %cst_27 = arith.constant dense<0.000000e+00> : vector<128xf32>
    %62 = vector.multi_reduction <add>, %61, %cst_27 [0] : vector<32x128xf32> to vector<128xf32>
    %63 = vector.shape_cast %62 : vector<128xf32> to vector<1x128xf32>
    %64 = tpu.concatenate %60, %63 in 0 : vector<1x128xf32>, vector<1x128xf32> -> vector<2x128xf32>
    %c0_28 = arith.constant 0 : index
    %c0_29 = arith.constant 0 : index
    %65 = vector.load %arg7[%c0_28, %c0_29] : memref<128x8xf32, #tpu.memory_space<vmem>>, vector<128x8xf32>
    %cst_30 = arith.constant dense<0.000000e+00> : vector<2x8xf32>
    %66 = tpu.matmul %64, %65, %cst_30 {dimension_numbers = #tpu.dot_dimension_numbers<[1], [0], [0], [1], [0, 0, 1, 1], [], []>} : vector<2x128xf32>, vector<128x8xf32>, vector<2x8xf32> -> vector<2x8xf32>
    %67 = vector.extract_strided_slice %66 {offsets = [0, 0], sizes = [1, 8], strides = [1, 1]} : vector<2x8xf32> to vector<1x8xf32>
    %cst_31 = arith.constant 5.120000e+02 : f32
    %68 = vector.broadcast %cst_31 : f32 to vector<1x8xf32>
    %69 = arith.divf %67, %68 : vector<1x8xf32>
    %70 = vector.extract_strided_slice %66 {offsets = [1, 0], sizes = [1, 8], strides = [1, 1]} : vector<2x8xf32> to vector<1x8xf32>
    %cst_32 = arith.constant 5.120000e+02 : f32
    %71 = vector.broadcast %cst_32 : f32 to vector<1x8xf32>
    %72 = arith.divf %70, %71 : vector<1x8xf32>
    %73 = arith.mulf %69, %69 : vector<1x8xf32>
    %74 = arith.subf %72, %73 : vector<1x8xf32>
    %cst_33 = arith.constant 0.000000e+00 : f32
    %75 = vector.broadcast %cst_33 : f32 to vector<1x8xf32>
    %76 = arith.maximumf %74, %75 : vector<1x8xf32>
    %c0_34 = arith.constant 0 : index
    %c0_35 = arith.constant 0 : index
    %77 = vector.load %arg5[%c0_34, %c0_35] : memref<1x8xf32, #tpu.memory_space<vmem>>, vector<1x8xf32>
    %cst_36 = arith.constant 9.99999974E-6 : f32
    %78 = vector.broadcast %cst_36 : f32 to vector<1x8xf32>
    %79 = arith.addf %76, %78 : vector<1x8xf32>
    %80 = math.rsqrt %79 : vector<1x8xf32>
    %81 = arith.mulf %77, %80 : vector<1x8xf32>
    %c0_37 = arith.constant 0 : index
    %c0_38 = arith.constant 0 : index
    %82 = vector.load %arg6[%c0_37, %c0_38] : memref<1x8xf32, #tpu.memory_space<vmem>>, vector<1x8xf32>
    %83 = arith.mulf %69, %81 : vector<1x8xf32>
    %84 = arith.subf %82, %83 : vector<1x8xf32>
    %85 = tpu.concatenate %81, %84 in 0 : vector<1x8xf32>, vector<1x8xf32> -> vector<2x8xf32>
    %c0_39 = arith.constant 0 : index
    %c0_40 = arith.constant 0 : index
    %86 = vector.load %arg8[%c0_39, %c0_40] : memref<8x128xf32, #tpu.memory_space<vmem>>, vector<8x128xf32>
    %cst_41 = arith.constant dense<0.000000e+00> : vector<2x128xf32>
    %87 = tpu.matmul %85, %86, %cst_41 {dimension_numbers = #tpu.dot_dimension_numbers<[1], [0], [0], [1], [0, 0, 1, 1], [], []>} : vector<2x8xf32>, vector<8x128xf32>, vector<2x128xf32> -> vector<2x128xf32>
    %88 = vector.extract_strided_slice %87 {offsets = [0, 0], sizes = [1, 128], strides = [1, 1]} : vector<2x128xf32> to vector<1x128xf32>
    %89 = vector.broadcast %88 : vector<1x128xf32> to vector<32x128xf32>
    %90 = arith.mulf %58, %89 : vector<32x128xf32>
    %91 = vector.extract_strided_slice %87 {offsets = [1, 0], sizes = [1, 128], strides = [1, 1]} : vector<2x128xf32> to vector<1x128xf32>
    %92 = vector.broadcast %91 : vector<1x128xf32> to vector<32x128xf32>
    %93 = arith.addf %90, %92 : vector<32x128xf32>
    %cst_42 = arith.constant 0.000000e+00 : f32
    %94 = vector.broadcast %cst_42 : f32 to vector<32x128xf32>
    %95 = arith.maximumf %93, %94 : vector<32x128xf32>
    %96 = vector.shape_cast %95 : vector<32x128xf32> to vector<2x16x128xf32>
    %c0_43 = arith.constant 0 : index
    %c0_44 = arith.constant 0 : index
    %c0_45 = arith.constant 0 : index
    %97 = vector.load %arg9[%c0_43, %c0_44, %c0_45] : memref<2x16x128xf32, #tpu.memory_space<vmem>>, vector<2x16x128xf32>
    tpu.vector_store %arg9[%c0_43, %c0_44, %c0_45], %96 {strides = array<i32>} : memref<2x16x128xf32, #tpu.memory_space<vmem>>, vector<2x16x128xf32>,
    return
  }
}

</mosaic_0001>

<bundles_post_ra>
// kernel: tile.9
= control target key start
LH: loop header
LB: loop body
LE: loop exit
PB: predicated region body
PF: predicated region fallthrough
CT: control target
= control target key end

     0   :  { %vm6_vm0 = vcmask 1043458   ;;  %vm10_vm1 = vcmask 1045508   ;;  %vm14_vm2 = vcmask 1047558   ;;  %s19_s6 = smov 3  ;;  %s22_s7 = smov 12  ;;  %vm16_vm3 = vcmask 64512   ;;  %s736_s0 = inlined_call_operand.vmem [shape: f32[16,8,8], index: 0, kind: input, shape index: {}]   ;;  %s737_s1 = inlined_call_operand.vmem [shape: f32[128,8], index: 1, kind: output, shape index: {}]  }
   0x1   :  { %v348_v0 = vld [vmem:[%s736_s0 + $0xf] ss:$16 sm:%s19_s6]   ;;  %s27_s12 = smov 48  ;;  %s32_s13 = smov 192  ;;  %vm38_vm4 = vcmask 1048512   ;;  %vm60_vm5 = vcmask 982912  }
   0x2   :  { %v349_v1 = vld [vmem:[%s736_s0 + $0xf] ss:$16 sm:%s22_s7]   ;;  %s63_s18 = smov 3  ;;  %s66_s21 = smov 12  ;;  %vm82_vm6 = vcmask 917312   ;;  %vm104_vm7 = vcmask 851712  }
   0x3   :  { %v25_v2 = vsel %vm6_vm0, %v349_v1, %v348_v0  ;;  %v350_v3 = vld [vmem:[%s736_s0 + $0xf] ss:$16 sm:%s27_s12]   ;;  %v356_v6 = vld [vmem:[%s736_s0 + $0xd] ss:$16 sm:%s63_s18]   ;;  %s71_s22 = smov 48  ;;  %s76_s27 = smov 192 }
   0x4   :  { %v351_v4 = vld [vmem:[%s736_s0 + $0xf] ss:$16 sm:%s32_s13]   ;;  %v30_v5 = vsel %vm10_vm1, %v350_v3, %v25_v2  ;;  %v357_v8 = vld [vmem:[%s736_s0 + $0xd] ss:$16 sm:%s66_s21]   ;;  %s423_s28 = smov 120   ;;  %s41_s2 = smov 3 }
   0x5   :  { %v35_v7 = vsel %vm14_vm2, %v351_v4, %v30_v5  ;;  %v358_v9 = vld [vmem:[%s736_s0 + $0xd] ss:$16 sm:%s71_s22]   ;;  %v69_v10 = vsel %vm6_vm0, %v357_v8, %v356_v6  ;;  %s44_s3 = smov 12  ;;  %v352_v13 = vld [vmem:[%s736_s0 + $0xe] ss:$16 sm:%s41_s2]   ;;  %s49_s8 = smov 48 }
   0x6   :  { %36 = vrot.lane.b32.xlu0 %v35_v7, %s423_s28  ;;  %v359_v11 = vld [vmem:[%s736_s0 + $0xd] ss:$16 sm:%s76_s27]   ;;  %v74_v12 = vsel %vm10_vm1, %v358_v9, %v69_v10  ;;  %s54_s9 = smov 192  ;;  %s85_s14 = smov 3  ;;  %vm126_vm8 = vcmask 786112   ;;  %vm148_vm9 = vcmask 720512  }
   0x7   :  { %v353_v14 = vld [vmem:[%s736_s0 + $0xe] ss:$16 sm:%s44_s3]   ;;  %v79_v15 = vsel %vm14_vm2, %v359_v11, %v74_v12  ;;  %s424_s15 = smov 104   ;;  %v360_v20 = vld [vmem:[%s736_s0 + $0xc] ss:$16 sm:%s85_s14]   ;;  %s88_s18 = smov 12 }
   0x8   :  { %v47_v16 = vsel %vm6_vm0, %v353_v14, %v352_v13  ;;  %v354_v17 = vld [vmem:[%s736_s0 + $0xe] ss:$16 sm:%s49_s8]   ;;  %80 = vrot.lane.b32.xlu1 %v79_v15, %s424_s15  ;;  %s93_s19 = smov 48  ;;  %s98_s24 = smov 192  ;;  %vm170_vm10 = vcmask 654912   ;;  %vm192_vm11 = vcmask 589312  }
   0x9   :  { %v355_v18 = vld [vmem:[%s736_s0 + $0xe] ss:$16 sm:%s54_s9]   ;;  %v52_v19 = vsel %vm10_vm1, %v354_v17, %v47_v16  ;;  %v361_v21 = vld [vmem:[%s736_s0 + $0xc] ss:$16 sm:%s88_s18]   ;;  %s151_s27 = smov 3  ;;  %s154_s28 = smov 12 }
   0xa   :  { %v362_v22 = vld [vmem:[%s736_s0 + $0xc] ss:$16 sm:%s93_s19]   ;;  %v57_v23 = vsel %vm14_vm2, %v355_v18, %v52_v19  ;;  %v91_v24 = vsel %vm6_vm0, %v361_v21, %v360_v20  ;;  %v372_v27 = vld [vmem:[%s736_s0 + $0x9] ss:$16 sm:%s151_s27]   ;;  %s159_s4 = smov 48  ;;  %s164_s7 = smov 192 }
   0xb   :  { %v363_v25 = vld [vmem:[%s736_s0 + $0xc] ss:$16 sm:%s98_s24]   ;;  %v96_v26 = vsel %vm10_vm1, %v362_v22, %v91_v24  ;;  %v373_v28 = vld [vmem:[%s736_s0 + $0x9] ss:$16 sm:%s154_s28]   ;;  %s173_s8 = smov 3  ;;  %s425_s9 = smov 112  }
   0xc   :  { %v157_v29 = vsel %vm6_vm0, %v373_v28, %v372_v27  ;;  %v374_v30 = vld [vmem:[%s736_s0 + $0x9] ss:$16 sm:%s159_s4]   ;;  %v101_v31 = vsel %vm14_vm2, %v363_v25, %v96_v26  ;;  %v376_v32 = vld [vmem:[%s736_s0 + $0x8] ss:$16 sm:%s173_s8]   ;;  %s176_s12 = smov 12  ;;  %s181_s13 = smov 48 }
   0xd   :  { %v377_v33 = vld [vmem:[%s736_s0 + $0x8] ss:$16 sm:%s176_s12]   ;;  %s186_s16 = smov 192  ;;  %v162_v34 = vsel %vm10_vm1, %v374_v30, %v157_v29  ;;  %v375_v35 = vld [vmem:[%s736_s0 + $0x9] ss:$16 sm:%s164_s7]   ;;  %s217_s21 = smov 3 }
   0xe   :  { %58 = vrot.lane.b32.xlu0 %v57_v23, %s425_s9  ;;  %v179_v36 = vsel %vm6_vm0, %v377_v33, %v376_v32  ;;  %v378_v37 = vld [vmem:[%s736_s0 + $0x8] ss:$16 sm:%s181_s13]   ;;  %s220_s22 = smov 12  ;;  %s426_s23 = smov 96   ;;  %v167_v40 = vsel %vm14_vm2, %v375_v35, %v162_v34  ;;  %vm214_vm12 = vcmask 523712   ;;  %vm236_vm13 = vcmask 458112  }
   0xf   :  { %s225_s24 = smov 48  ;;  %v384_v38 = vld [vmem:[%s736_s0 + $0x6] ss:$16 sm:%s217_s21]   ;;  %s239_s29 = smov 3  ;;  %v184_v41 = vsel %vm10_vm1, %v378_v37, %v179_v36  ;;  %v379_v42 = vld [vmem:[%s736_s0 + $0x8] ss:$16 sm:%s186_s16]  }
  0x10   :  { %102 = vrot.lane.b32.xlu1 %v101_v31, %s426_s23  ;;  %v385_v39 = vld [vmem:[%s736_s0 + $0x6] ss:$16 sm:%s220_s22]   ;;  %s230_s3 = smov 192  ;;  %s242_s4 = smov 12  ;;  %v189_v47 = vsel %vm14_vm2, %v379_v42, %v184_v41  ;;  %vm258_vm14 = vcmask 392512   ;;  %vm280_vm15 = vcmask 326912  }
  0x11   :  { %v386_v43 = vld [vmem:[%s736_s0 + $0x6] ss:$16 sm:%s225_s24]   ;;  %s247_s7 = smov 48  ;;  %v223_v44 = vsel %vm6_vm0, %v385_v39, %v384_v38  ;;  %v388_v45 = vld [vmem:[%s736_s0 + $0x5] ss:$16 sm:%s239_s29]   ;;  %s107_s12 = smov 3 }
  0x12   :  { %v389_v46 = vld [vmem:[%s736_s0 + $0x5] ss:$16 sm:%s242_s4]   ;;  %s110_s13 = smov 12  ;;  %s427_s14 = smov 72   ;;  %v387_v48 = vld [vmem:[%s736_s0 + $0x6] ss:$16 sm:%s230_s3]   ;;  %v228_v52 = vsel %vm10_vm1, %v386_v43, %v223_v44 }
  0x13   :  { %v364_v49 = vld [vmem:[%s736_s0 + $0xb] ss:$16 sm:%s107_s12]   ;;  %s115_s19 = smov 48  ;;  %s120_s20 = smov 192  ;;  %v245_v53 = vsel %vm6_vm0, %v389_v46, %v388_v45  ;;  %v390_v54 = vld [vmem:[%s736_s0 + $0x5] ss:$16 sm:%s247_s7]   ;;  %v233_v61 = vsel %vm14_vm2, %v387_v48, %v228_v52 }
  0x14   :  { %s252_s21 = smov 192  ;;  %v365_v50 = vld [vmem:[%s736_s0 + $0xb] ss:$16 sm:%s110_s13]   ;;  %s283_s26 = smov 3  ;;  %v250_v62 = vsel %vm10_vm1, %v390_v54, %v245_v53 }
  0x15   :  { %v366_v51 = vld [vmem:[%s736_s0 + $0xb] ss:$16 sm:%s115_s19]   ;;  %v113_v55 = vsel %vm6_vm0, %v365_v50, %v364_v49  ;;  %s286_s2 = smov 12  ;;  %s428_s3 = smov 64   ;;  %v396_v59 = vld [vmem:[%s736_s0 + $0x3] ss:$16 sm:%s283_s26]  }
  0x16   :  { %168 = vrot.lane.b32.xlu0 %v167_v40, %s427_s14  ;;  %v367_v56 = vld [vmem:[%s736_s0 + $0xb] ss:$16 sm:%s120_s20]   ;;  %v118_v57 = vsel %vm10_vm1, %v366_v51, %v113_v55  ;;  %s291_s4 = smov 48  ;;  %s305_s9 = smov 3 }
  0x17   :  { %v123_v58 = vsel %vm14_vm2, %v367_v56, %v118_v57  ;;  %v397_v60 = vld [vmem:[%s736_s0 + $0x3] ss:$16 sm:%s286_s2]   ;;  %s308_s10 = smov 12  ;;  %v391_v63 = vld [vmem:[%s736_s0 + $0x5] ss:$16 sm:%s252_s21]   ;;  %s429_s13 = smov 88  }
  0x18   :  { %190 = vrot.lane.b32.xlu1 %v189_v47, %s428_s3  ;;  %124 = vrot.lane.b32.xlu2 %v123_v58, %s429_s13  ;;  %s296_s14 = smov 192  ;;  %s313_s15 = smov 48  ;;  %v398_v0 = vld [vmem:[%s736_s0 + $0x3] ss:$16 sm:%s291_s4]   ;;  %v289_v2 = vsel %vm6_vm0, %v397_v60, %v396_v59  ;;  %v255_v5 = vsel %vm14_vm2, %v391_v63, %v250_v62 }
  0x19   :  { %v400_v1 = vld [vmem:[%s736_s0 + $0x2] ss:$16 sm:%s305_s9]   ;;  %s129_s20 = smov 3  ;;  %s132_s25 = smov 12  ;;  %v399_v6 = vld [vmem:[%s736_s0 + $0x3] ss:$16 sm:%s296_s14]   ;;  %v294_v12 = vsel %vm10_vm1, %v398_v0, %v289_v2 }
  0x1a   :  { %v401_v3 = vld [vmem:[%s736_s0 + $0x2] ss:$16 sm:%s308_s10]   ;;  %v368_v4 = vld [vmem:[%s736_s0 + $0xa] ss:$16 sm:%s129_s20]   ;;  %s137_s26 = smov 48  ;;  %s430_s27 = smov 48   ;;  %v299_v20 = vsel %vm14_vm2, %v399_v6, %v294_v12 }
  0x1b   :  { %v402_v7 = vld [vmem:[%s736_s0 + $0x2] ss:$16 sm:%s313_s15]   ;;  %s318_s3 = smov 192  ;;  %v369_v8 = vld [vmem:[%s736_s0 + $0xa] ss:$16 sm:%s132_s25]   ;;  %s142_s6 = smov 192  ;;  %v311_v13 = vsel %vm6_vm0, %v401_v3, %v400_v1 }
  0x1c   :  { %v135_v9 = vsel %vm6_vm0, %v369_v8, %v368_v4  ;;  %v370_v10 = vld [vmem:[%s736_s0 + $0xa] ss:$16 sm:%s137_s26]   ;;  %s195_s11 = smov 3  ;;  %s198_s12 = smov 12  ;;  %v316_v21 = vsel %vm10_vm1, %v402_v7, %v311_v13  ;;  %v403_v22 = vld [vmem:[%s736_s0 + $0x2] ss:$16 sm:%s318_s3]  }
  0x1d   :  { %v371_v11 = vld [vmem:[%s736_s0 + $0xa] ss:$16 sm:%s142_s6]   ;;  %v140_v14 = vsel %vm10_vm1, %v370_v10, %v135_v9  ;;  %v380_v15 = vld [vmem:[%s736_s0 + $0x7] ss:$16 sm:%s195_s11]   ;;  %s203_s17 = smov 48  ;;  %s431_s18 = smov 40   ;;  %v321_v25 = vsel %vm14_vm2, %v403_v22, %v316_v21 }
  0x1e   :  { %234 = vrot.lane.b32.xlu0 %v233_v61, %s430_s27  ;;  %v381_v16 = vld [vmem:[%s736_s0 + $0x7] ss:$16 sm:%s198_s12]   ;;  %v145_v17 = vsel %vm14_vm2, %v371_v11, %v140_v14  ;;  %s208_s21 = smov 192  ;;  %s432_s24 = smov 80  }
  0x1f   :  { %v201_v18 = vsel %vm6_vm0, %v381_v16, %v380_v15  ;;  %v382_v19 = vld [vmem:[%s736_s0 + $0x7] ss:$16 sm:%s203_s17]   ;;  %s261_s25 = smov 3  ;;  %s264_s26 = smov 12 }
  0x20   :  { %256 = vrot.lane.b32.xlu1 %v255_v5, %s431_s18  ;;  %146 = vrot.lane.b32.xlu2 %v145_v17, %s432_s24  ;;  %v206_v23 = vsel %vm10_vm1, %v382_v19, %v201_v18  ;;  %v383_v24 = vld [vmem:[%s736_s0 + $0x7] ss:$16 sm:%s208_s21]   ;;  %s433_s29 = smov 24   ;;  %s269_s5 = smov 48 }
  0x21   :  { %v392_v26 = vld [vmem:[%s736_s0 + $0x4] ss:$16 sm:%s261_s25]   ;;  %v211_v28 = vsel %vm14_vm2, %v383_v24, %v206_v23  ;;  %s434_s6 = smov 16   ;;  %s274_s9 = smov 192 }
  0x22   :  { %v393_v27 = vld [vmem:[%s736_s0 + $0x4] ss:$16 sm:%s264_s26]   ;;  %s435_s10 = smov 56   ;;  %s327_s11 = smov 3 }
  0x23   :  { %v267_v29 = vsel %vm6_vm0, %v393_v27, %v392_v26  ;;  %v394_v30 = vld [vmem:[%s736_s0 + $0x4] ss:$16 sm:%s269_s5]   ;;  %s330_s12 = smov 12  ;;  %v404_v33 = vld [vmem:[%s736_s0 + $0x1] ss:$16 sm:%s327_s11]   ;;  %s335_s19 = smov 48 }
  0x24   :  { %v272_v31 = vsel %vm10_vm1, %v394_v30, %v267_v29  ;;  %v395_v32 = vld [vmem:[%s736_s0 + $0x4] ss:$16 sm:%s274_s9]   ;;  %v405_v34 = vld [vmem:[%s736_s0 + $0x1] ss:$16 sm:%s330_s12]   ;;  %s340_s22 = smov 192  ;;  %s436_s23 = smov 32  }
  0x25   :  { %v277_v35 = vsel %vm14_vm2, %v395_v32, %v272_v31  ;;  %v333_v36 = vsel %vm6_vm0, %v405_v34, %v404_v33  ;;  %v406_v37 = vld [vmem:[%s736_s0 + $0x1] ss:$16 sm:%s335_s19]   ;;  %s437_s26 = smov 8   ;;  %s2_s27 = smov 3 }
  0x26   :  { %300 = vrot.lane.b32.xlu0 %v299_v20, %s433_s29  ;;  %v338_v38 = vsel %vm10_vm1, %v406_v37, %v333_v36  ;;  %v407_v39 = vld [vmem:[%s736_s0 + $0x1] ss:$16 sm:%s340_s22]   ;;  %s4_s28 = smov 12  ;;  %s8_s29 = smov 48 }
  0x27   :  { %v343_v40 = vsel %vm14_vm2, %v407_v39, %v338_v38  ;;  %s12_s30 = smov 192  ;;  %v3_v41 = vld [vmem:[%s736_s0] ss:$16 sm:%s2_s27]  }
  0x28   :  { %322 = vrot.lane.b32.xlu1 %v321_v25, %s434_s6  ;;  %212 = vrot.lane.b32.xlu2 %v211_v28, %s435_s10  ;;  %v5_v42 = vld [vmem:[%s736_s0] ss:$16 sm:%s4_s28]  }
  0x29   :  { %v7_v43 = vsel %vm6_vm0, %v5_v42, %v3_v41  ;;  %v9_v44 = vld [vmem:[%s736_s0] ss:$16 sm:%s8_s29]   ;;  %vm302_vm0 = vcmask 261312  }
  0x2a   :  { %v11_v45 = vsel %vm10_vm1, %v9_v44, %v7_v43  ;;  %v13_v46 = vld [vmem:[%s736_s0] ss:$16 sm:%s12_s30]   ;;  %vm324_vm1 = vcmask 195712  }
  0x2b   :  { %v15_v47 = vsel %vm14_vm2, %v13_v46, %v11_v45  ;;  %vm346_vm2 = vcmask 130112  }
  0x2c   :  { %17 = vst.msk [vmem:[%s737_s1] sm:$0xff] %vm16_vm3, %v15_v47  }
  0x30   :  { %278 = vrot.lane.b32.xlu2 %v277_v35, %s436_s23 }
  0x38   :  { %344 = vrot.lane.b32.xlu2 %v343_v40, %s437_s26 }
  0x72   :  { %v125_v48 = vpop.permute.xlu2 %124  }
  0x78   :  { %v37_v49 = vpop.permute.xlu0 %36  }
  0x79   :  { %39 = vst.msk [vmem:[%s737_s1] sm:$0xff] %vm38_vm4, %v37_v49  }
  0x7a   :  { %v81_v50 = vpop.permute.xlu1 %80   ;;  %v147_v51 = vpop.permute.xlu2 %146  }
  0x80   :  { %v59_v52 = vpop.permute.xlu0 %58  }
  0x81   :  { %61 = vst.msk [vmem:[%s737_s1] sm:$0xff] %vm60_vm5, %v59_v52  }
  0x82   :  { %83 = vst.msk [vmem:[%s737_s1] sm:$0xff] %vm82_vm6, %v81_v50   ;;  %v103_v53 = vpop.permute.xlu1 %102   ;;  %v213_v54 = vpop.permute.xlu2 %212  }
  0x83   :  { %105 = vst.msk [vmem:[%s737_s1] sm:$0xff] %vm104_vm7, %v103_v53  }
  0x84   :  { %127 = vst.msk [vmem:[%s737_s1] sm:$0xff] %vm126_vm8, %v125_v48  }
  0x85   :  { %149 = vst.msk [vmem:[%s737_s1] sm:$0xff] %vm148_vm9, %v147_v51  }
  0x88   :  { %v169_v55 = vpop.permute.xlu0 %168  }
  0x89   :  { %171 = vst.msk [vmem:[%s737_s1] sm:$0xff] %vm170_vm10, %v169_v55  }
  0x8a   :  { %v191_v56 = vpop.permute.xlu1 %190   ;;  %v279_v57 = vpop.permute.xlu2 %278  }
  0x8b   :  { %193 = vst.msk [vmem:[%s737_s1] sm:$0xff] %vm192_vm11, %v191_v56  }
  0x8c   :  { %215 = vst.msk [vmem:[%s737_s1] sm:$0xff] %vm214_vm12, %v213_v54  }
  0x90   :  { %v235_v58 = vpop.permute.xlu0 %234  }
  0x91   :  { %237 = vst.msk [vmem:[%s737_s1] sm:$0xff] %vm236_vm13, %v235_v58  }
  0x92   :  { %v257_v59 = vpop.permute.xlu1 %256   ;;  %v345_v60 = vpop.permute.xlu2 %344  }
  0x93   :  { %259 = vst.msk [vmem:[%s737_s1] sm:$0xff] %vm258_vm14, %v257_v59  }
  0x94   :  { %281 = vst.msk [vmem:[%s737_s1] sm:$0xff] %vm280_vm15, %v279_v57  }
  0x98   :  { %v301_v61 = vpop.permute.xlu0 %300  }
  0x99   :  { %303 = vst.msk [vmem:[%s737_s1] sm:$0xff] %vm302_vm0, %v301_v61  }
  0x9a   :  { %v323_v62 = vpop.permute.xlu1 %322  }
  0x9b   :  { %325 = vst.msk [vmem:[%s737_s1] sm:$0xff] %vm324_vm1, %v323_v62  }
  0x9c   :  { %347 = vst.msk [vmem:[%s737_s1] sm:$0xff] %vm346_vm2, %v345_v60  }

// kernel: encoding_block_forward.1
= control target key start
LH: loop header
LB: loop body
LE: loop exit
PB: predicated region body
PF: predicated region fallthrough
CT: control target
= control target key end

     0   :  { %s985_s17 = smov 64   ;;  %vm54_vm0 = vcmask 1046528   ;;  %vm79_vm1 = vcmask 523264   ;;  %vm41_vm2 = vcmask 1040384   ;;  %vm327_vm7 = vcmask 64512   ;;  %s1325_s0 = inlined_call_operand.vmem [shape: f32[2,16,64], index: 0, kind: input, shape index: {}]   ;;  %s1326_s1 = inlined_call_operand.vmem [shape: bf16[192,128], index: 1, kind: input, shape index: {}]   ;;  %s1327_s7 = inlined_call_operand.vmem [shape: f32[128,8], index: 7, kind: input, shape index: {}]   ;;  %s1328_s8 = inlined_call_operand.vmem [shape: f32[8,128], index: 8, kind: input, shape index: {}]   ;;  %s1329_s4 = inlined_call_operand.vmem [shape: bf16[384,128], index: 4, kind: input, shape index: {}]   ;;  %s1330_s2 = inlined_call_operand.vmem [shape: f32[1,8], index: 2, kind: input, shape index: {}]   ;;  %s1331_s3 = inlined_call_operand.vmem [shape: f32[1,8], index: 3, kind: input, shape index: {}]   ;;  %s1332_s5 = inlined_call_operand.vmem [shape: f32[1,8], index: 5, kind: input, shape index: {}]   ;;  %s1333_s6 = inlined_call_operand.vmem [shape: f32[1,8], index: 6, kind: input, shape index: {}]   ;;  %s1334_s9 = inlined_call_operand.vmem [shape: f32[2,16,128], index: 9, kind: output, shape index: {}]  }
   0x1   :  { %v33_v0 = vld [vmem:[%s1325_s0] sm:$0xff]  ;;  %v34_v1 = vld [vmem:[%s1325_s0 + $0x8] sm:$0xff]  ;;  %v937_v3 = vld [vmem:[%s1326_s1 + $0x38] sm:$0xff]  ;;  %vm987_vm9 = vmmov 1  }
   0x2   :  { %v969_v2 = vpack.i.bf16 %v34_v1, %v33_v0  ;;  %v941_v4 = vld [vmem:[%s1326_s1 + $0x58] sm:$0xff]  ;;  %190 = vmatpush.bf16.msra.mxu0 %v937_v3  ;;  %v936_v5 = vld [vmem:[%s1326_s1 + $0x30] sm:$0xff]  ;;  %v935_v10 = vld [vmem:[%s1326_s1 + $0x28] sm:$0xff]  ;;  %v56_v11 = vrot.slane %v34_v1, 1  ;;  %v55_v12 = vrot.slane %v33_v0, 1  ;;  %v43_v22 = vrot.slane %v34_v1, 7 }
   0x3   :  { %v35_v6 = vld [vmem:[%s1325_s0 + $0x10] sm:$0xff]  ;;  %v36_v7 = vld [vmem:[%s1325_s0 + $0x18] sm:$0xff]  ;;  %213 = vmatpush.bf16.msra.mxu1 %v941_v4  ;;  %v939_v13 = vld [vmem:[%s1326_s1 + $0x48] sm:$0xff]  ;;  %v42_v23 = vrot.slane %v33_v0, 7 }
   0x4   :  { %970 = vrot.lane.b32.xlu0 %v969_v2, %s985_s17  ;;  %v940_v8 = vld [vmem:[%s1326_s1 + $0x50] sm:$0xff]  ;;  %v974_v9 = vpack.i.bf16 %v36_v7, %v35_v6  ;;  %v934_v14 = vld [vmem:[%s1326_s1 + $0x20] sm:$0xff]  ;;  %v57_v16 = vsel %vm54_vm0, %v55_v12, %v56_v11  ;;  %v65_v17 = vsel %vm54_vm0, %v56_v11, 0.0  ;;  %v933_v18 = vld [vmem:[%s1326_s1 + $0x18] sm:$0xff]  ;;  %v58_v26 = vrot.slane %v35_v6, 1 }
   0x5   :  { %v938_v15 = vld [vmem:[%s1326_s1 + $0x40] sm:$0xff]  ;;  %v85_v19 = vpack.c.bf16 %v65_v17, %v57_v16  ;;  %v932_v20 = vld [vmem:[%s1326_s1 + $0x10] sm:$0xff]  ;;  %v931_v21 = vld [vmem:[%s1326_s1 + $0x8] sm:$0xff]  ;;  %v44_v25 = vsel %vm41_vm2, %v42_v23, %v43_v22  ;;  %v59_v27 = vrot.slane %v36_v7, 1  ;;  %v52_v32 = vsel %vm41_vm2, 0.0, %v42_v23 }
   0x6   :  { %191 = vmatpush.bf16.msra.mxu0 %v936_v5  ;;  %v930_v24 = vld [vmem:[%s1326_s1] sm:$0xff]  ;;  %v46_v38 = vrot.slane %v36_v7, 7  ;;  %v45_v40 = vrot.slane %v35_v6, 7  ;;  %v266_v48 = vld [vmem:[%s1327_s7 + $0x78] sm:$0xff]  ;;  %v265_v49 = vld [vmem:[%s1327_s7 + $0x70] sm:$0xff] }
   0x7   :  { %214 = vmatpush.bf16.msra.mxu1 %v940_v8  ;;  %v60_v28 = vsel %vm54_vm0, %v58_v26, %v59_v27  ;;  %v66_v29 = vsel %vm54_vm0, %v59_v27, 0.0  ;;  %267 = vmatpush.msra.mxu2 %v266_v48  ;;  %v264_v50 = vld [vmem:[%s1327_s7 + $0x68] sm:$0xff]  ;;  %v263_v51 = vld [vmem:[%s1327_s7 + $0x60] sm:$0xff]  ;;  %v262_v52 = vld [vmem:[%s1327_s7 + $0x58] sm:$0xff] }
   0x8   :  { %v87_v30 = vpack.c.bf16 %v66_v29, %v60_v28  ;;  %v47_v43 = vsel %vm41_vm2, %v45_v40, %v46_v38  ;;  %v53_v44 = vsel %vm41_vm2, 0.0, %v45_v40  ;;  %v261_v53 = vld [vmem:[%s1327_s7 + $0x50] sm:$0xff]  ;;  %v260_v54 = vld [vmem:[%s1327_s7 + $0x48] sm:$0xff]  ;;  %v259_v56 = vld [vmem:[%s1327_s7 + $0x40] sm:$0xff] }
   0x9   :  { %268 = vmatpush.msra.mxu2 %v265_v49  ;;  %v258_v57 = vld [vmem:[%s1327_s7 + $0x38] sm:$0xff]  ;;  %v257_v58 = vld [vmem:[%s1327_s7 + $0x30] sm:$0xff]  ;;  %v256_v59 = vld [vmem:[%s1327_s7 + $0x28] sm:$0xff] }
   0xa   :  { %192 = vmatpush.bf16.msra.mxu0 %v935_v10  ;;  %v255_v61 = vld [vmem:[%s1327_s7 + $0x20] sm:$0xff]  ;;  %v254_v62 = vld [vmem:[%s1327_s7 + $0x18] sm:$0xff]  ;;  %v253_v0 = vld [vmem:[%s1327_s7 + $0x10] sm:$0xff] }
   0xb   :  { %215 = vmatpush.bf16.msra.mxu1 %v939_v13  ;;  %269 = vmatpush.msra.mxu2 %v264_v50  ;;  %v252_v1 = vld [vmem:[%s1327_s7 + $0x8] sm:$0xff]  ;;  %v251_v3 = vld [vmem:[%s1327_s7] sm:$0xff]  ;;  %vm915_vm8 = vmneg %vm41_vm2 }
   0xc   :  { %975 = vrot.lane.b32.xlu0 %v974_v9, %s985_s17  ;;  %vm1265_vm10 = vmpackc.low %vm987_vm9, %vm915_vm8 }
   0xd   :  { %270 = vmatpush.msra.mxu2 %v263_v51  ;;  %vm1271_vm11 = vmpackc.low %vm54_vm0, %vm987_vm9 }
   0xe   :  { %193 = vmatpush.bf16.msra.mxu0 %v934_v14 }
   0xf   :  { %216 = vmatpush.bf16.msra.mxu1 %v938_v15  ;;  %271 = vmatpush.msra.mxu2 %v262_v52 }
  0x11   :  { %272 = vmatpush.msra.mxu2 %v261_v53 }
  0x12   :  { %194 = vmatpush.bf16.msra.mxu0 %v933_v18  ;;  %816 = vmatmul.msk.bf16.vlgmr.msra.gmra.mxu1 %vm79_vm1, %v85_v19 }
  0x13   :  { %273 = vmatpush.msra.mxu2 %v260_v54 }
  0x15   :  { %274 = vmatpush.msra.mxu2 %v259_v56 }
  0x16   :  { %195 = vmatpush.bf16.msra.mxu0 %v932_v20 }
  0x17   :  { %275 = vmatpush.msra.mxu2 %v258_v57 }
  0x19   :  { %276 = vmatpush.msra.mxu2 %v257_v58 }
  0x1a   :  { %196 = vmatpush.bf16.msra.mxu0 %v931_v21 }
  0x1b   :  { %277 = vmatpush.msra.mxu2 %v256_v59 }
  0x1d   :  { %278 = vmatpush.msra.mxu2 %v255_v61 }
  0x1e   :  { %197 = vmatpush.bf16.msra.mxu0 %v930_v24 }
  0x1f   :  { %279 = vmatpush.msra.mxu2 %v254_v62 }
  0x21   :  { %280 = vmatpush.msra.mxu2 %v253_v0 }
  0x22   :  { %817 = vmatmul.msk.bf16.gmra.mxu1 %vm79_vm1, %v87_v30 }
  0x23   :  { %281 = vmatpush.msra.mxu2 %v252_v1 }
  0x25   :  { %282 = vmatpush.msra.mxu2 %v251_v3 }
  0x27   :  { %671 = vmatpush.msrb.mxu2 %v266_v48  ;;  %v1175_v48 = vld [vmem:[%s1328_s8] sm:$0xff] }
  0x28   :  { %346 = vmatpush.msra.mxu3 %v1175_v48 }
  0x29   :  { %672 = vmatpush.msrb.mxu2 %v265_v49 }
  0x2b   :  { %673 = vmatpush.msrb.mxu2 %v264_v50  ;;  %v957_v50 = vld [vmem:[%s1329_s4 + $0x78] sm:$0xff] }
  0x2c   :  { %610 = vmatpush.bf16.msrb.mxu1 %v957_v50 }
  0x2d   :  { %674 = vmatpush.msrb.mxu2 %v263_v51  ;;  %v949_v51 = vld [vmem:[%s1329_s4 + $0x38] sm:$0xff] }
  0x2e   :  { %591 = vmatpush.bf16.msrb.mxu3 %v949_v51 }
  0x2f   :  { %675 = vmatpush.msrb.mxu2 %v262_v52  ;;  %v965_v52 = vld [vmem:[%s1329_s4 + $0xb8] sm:$0xff] }
  0x30   :  { %629 = vmatpush.bf16.msrb.mxu0 %v965_v52 }
  0x31   :  { %676 = vmatpush.msrb.mxu2 %v261_v53  ;;  %v956_v53 = vld [vmem:[%s1329_s4 + $0x70] sm:$0xff] }
  0x32   :  { %611 = vmatpush.bf16.msrb.mxu1 %v956_v53 }
  0x33   :  { %677 = vmatpush.msrb.mxu2 %v260_v54  ;;  %v948_v54 = vld [vmem:[%s1329_s4 + $0x30] sm:$0xff] }
  0x34   :  { %592 = vmatpush.bf16.msrb.mxu3 %v948_v54 }
  0x35   :  { %678 = vmatpush.msrb.mxu2 %v259_v56  ;;  %v964_v56 = vld [vmem:[%s1329_s4 + $0xb0] sm:$0xff] }
  0x36   :  { %630 = vmatpush.bf16.msrb.mxu0 %v964_v56 }
  0x37   :  { %679 = vmatpush.msrb.mxu2 %v258_v57 }
  0x39   :  { %680 = vmatpush.msrb.mxu2 %v257_v58 }
  0x3b   :  { %681 = vmatpush.msrb.mxu2 %v256_v59  ;;  %v955_v59 = vld [vmem:[%s1329_s4 + $0x68] sm:$0xff] }
  0x3c   :  { %612 = vmatpush.bf16.msrb.mxu1 %v955_v59 }
  0x3d   :  { %682 = vmatpush.msrb.mxu2 %v255_v61  ;;  %v963_v61 = vld [vmem:[%s1329_s4 + $0xa8] sm:$0xff] }
  0x3e   :  { %631 = vmatpush.bf16.msrb.mxu0 %v963_v61 }
  0x3f   :  { %683 = vmatpush.msrb.mxu2 %v254_v62 }
  0x41   :  { %684 = vmatpush.msrb.mxu2 %v253_v0  ;;  %v954_v0 = vld [vmem:[%s1329_s4 + $0x60] sm:$0xff] }
  0x42   :  { %613 = vmatpush.bf16.msrb.mxu1 %v954_v0 }
  0x43   :  { %685 = vmatpush.msrb.mxu2 %v252_v1  ;;  %v946_v1 = vld [vmem:[%s1329_s4 + $0x20] sm:$0xff] }
  0x45   :  { %686 = vmatpush.msrb.mxu2 %v251_v3 }
  0x76   :  { %v971_v31 = vpop.permute.xlu0 %970 }
  0x77   :  { %v973_v33 = vunpack.i.h.bf16 %v971_v31  ;;  %v972_v34 = vunpack.i.l.bf16 %v971_v31 }
  0x79   :  { %v80_v35 = vsel %vm79_vm1, %v52_v32, %v972_v34  ;;  %v81_v36 = vsel %vm79_vm1, %v44_v25, %v973_v33 }
  0x7a   :  { %v84_v37 = vpack.c.bf16 %v81_v36, %v80_v35  ;;  %v986_v35 = vmov 512.0  }
  0x7b   :  { %979 = vrcp.f32 %v986_v35 }
  0x7c   :  { %198 = vmatmul.bf16.vlgmr.msra.gmra.mxu0 %v84_v37 }
  0x7e   :  { %v976_v39 = vpop.permute.xlu0 %975 }
  0x7f   :  { %v978_v41 = vunpack.i.h.bf16 %v976_v39  ;;  %v977_v42 = vunpack.i.l.bf16 %v976_v39 }
  0x81   :  { %v82_v45 = vsel %vm79_vm1, %v53_v44, %v977_v42  ;;  %v83_v46 = vsel %vm79_vm1, %v47_v43, %v978_v41  ;;  %v980_v36 = vpop.eup %979 }
  0x82   :  { %v86_v47 = vpack.c.bf16 %v83_v46, %v82_v45  ;;  %v288_v37 = vmul.f32 512.0, %v980_v36  ;;  %vm292_vm3 = vweird.f32 %v980_v36 }
  0x84   :  { %v289_v38 = vsub.f32 1.0, %v288_v37 }
  0x86   :  { %v290_v39 = vmul.f32 %v980_v36, %v289_v38 }
  0x88   :  { %v291_v40 = vadd.f32 %v980_v36, %v290_v39 }
  0x8a   :  { %v1169_v41 = vsel %vm292_vm3, %v980_v36, %v291_v40 }
  0x8c   :  { %203 = vmatmul.bf16.gmra.mxu0 %v86_v47 }
  0x8f   :  { %v218_v55 = vpop.f32.mrf.mxu1 }
  0x97   :  { %v220_v63 = vpop.f32.mrf.mxu1 }
  0x9f   :  { %v223_v4 = vpop.f32.mrf.mxu1 }
  0xa7   :  { %v225_v13 = vpop.f32.mrf.mxu1 }
  0xf9   :  { %v199_v60 = vpop.f32.mrf.mxu0 }
  0xfa   :  { %v1150_v7 = vadd.f32 %v218_v55, %v199_v60  ;;  %v947_v60 = vld [vmem:[%s1329_s4 + $0x28] sm:$0xff] }
  0xfb   :  { %593 = vmatpush.bf16.msrb.mxu3 %v947_v60 }
  0xfc   :  { %v237_v10 = vmul.f32 %v1150_v7, %v1150_v7 }
  0xff   :  { %594 = vmatpush.bf16.msrb.mxu3 %v946_v1 }
 0x101   :  { %v201_v2 = vpop.f32.mrf.mxu0 }
 0x102   :  { %v1148_v6 = vadd.f32 %v220_v63, %v201_v2  ;;  %v962_v2 = vld [vmem:[%s1329_s4 + $0xa0] sm:$0xff] }
 0x103   :  { %632 = vmatpush.bf16.msrb.mxu0 %v962_v2 }
 0x104   :  { %v238_v9 = vmul.f32 %v1148_v6, %v1148_v6  ;;  %v228_v11 = vadd.f32 %v1148_v6, %v1150_v7 }
 0x106   :  { %v241_v15 = vadd.f32 %v238_v9, %v237_v10  ;;  %v945_v9 = vld [vmem:[%s1329_s4 + $0x18] sm:$0xff] }
 0x107   :  { %v961_v10 = vld [vmem:[%s1329_s4 + $0x98] sm:$0xff]  ;;  %595 = vmatpush.bf16.msrb.mxu3 %v945_v9 }
 0x108   :  { %633 = vmatpush.bf16.msrb.mxu0 %v961_v10 }
 0x109   :  { %v204_v5 = vpop.f32.mrf.mxu0 }
 0x10a   :  { %v1152_v8 = vadd.f32 %v223_v4, %v204_v5  ;;  %v953_v5 = vld [vmem:[%s1329_s4 + $0x58] sm:$0xff] }
 0x10b   :  { %614 = vmatpush.bf16.msrb.mxu1 %v953_v5 }
 0x10c   :  { %v239_v12 = vmul.f32 %v1152_v8, %v1152_v8  ;;  %v229_v16 = vadd.f32 %v228_v11, %v1152_v8  ;;  %v301_v11 = vld [vmem:[%s1330_s2] sm:$0x1] }
 0x10e   :  { %v242_v18 = vadd.f32 %v241_v15, %v239_v12 }
 0x111   :  { %v206_v14 = vpop.f32.mrf.mxu0 }
 0x112   :  { %v1163_v17 = vadd.f32 %v225_v13, %v206_v14  ;;  %v319_v14 = vld [vmem:[%s1331_s3] sm:$0x1] }
 0x114   :  { %v230_v19 = vadd.f32 %v229_v16, %v1163_v17  ;;  %v240_v20 = vmul.f32 %v1163_v17, %v1163_v17 }
 0x116   :  { %v231_v21 = vrot.slane %v230_v19, 4  ;;  %v243_v22 = vadd.f32 %v242_v18, %v240_v20  ;;  %v952_v20 = vld [vmem:[%s1329_s4 + $0x50] sm:$0xff] }
 0x117   :  { %615 = vmatpush.bf16.msrb.mxu1 %v952_v20 }
 0x118   :  { %v232_v23 = vadd.f32 %v231_v21, %v230_v19  ;;  %v244_v24 = vrot.slane %v243_v22, 4  ;;  %v944_v21 = vld [vmem:[%s1329_s4 + $0x10] sm:$0xff] }
 0x119   :  { %596 = vmatpush.bf16.msrb.mxu3 %v944_v21 }
 0x11a   :  { %v233_v25 = vrot.slane %v232_v23, 2  ;;  %v245_v26 = vadd.f32 %v244_v24, %v243_v22  ;;  %v960_v22 = vld [vmem:[%s1329_s4 + $0x90] sm:$0xff]  ;;  %v943_v24 = vld [vmem:[%s1329_s4 + $0x8] sm:$0xff] }
 0x11b   :  { %634 = vmatpush.bf16.msrb.mxu0 %v960_v22 }
 0x11c   :  { %v234_v27 = vadd.f32 %v233_v25, %v232_v23  ;;  %v246_v28 = vrot.slane %v245_v26, 2  ;;  %v951_v23 = vld [vmem:[%s1329_s4 + $0x48] sm:$0xff] }
 0x11d   :  { %v959_v25 = vld [vmem:[%s1329_s4 + $0x88] sm:$0xff]  ;;  %616 = vmatpush.bf16.msrb.mxu1 %v951_v23  ;;  %597 = vmatpush.bf16.msrb.mxu3 %v943_v24 }
 0x11e   :  { %v235_v29 = vrot.slane %v234_v27, 1  ;;  %v247_v30 = vadd.f32 %v246_v28, %v245_v26  ;;  %v950_v26 = vld [vmem:[%s1329_s4 + $0x40] sm:$0xff] }
 0x11f   :  { %635 = vmatpush.bf16.msrb.mxu0 %v959_v25  ;;  %v958_v28 = vld [vmem:[%s1329_s4 + $0x80] sm:$0xff] }
 0x120   :  { %v248_v31 = vrot.slane %v247_v30, 1  ;;  %v236_v32 = vadd.f32 %v235_v29, %v234_v27  ;;  %v942_v27 = vld [vmem:[%s1329_s4] sm:$0xff] }
 0x121   :  { %617 = vmatpush.bf16.msrb.mxu1 %v950_v26  ;;  %598 = vmatpush.bf16.msrb.mxu3 %v942_v27 }
 0x122   :  { %v249_v33 = vadd.f32 %v248_v31, %v247_v30 }
 0x123   :  { %636 = vmatpush.bf16.msrb.mxu0 %v958_v28 }
 0x124   :  { %v250_v34 = vsel %vm41_vm2, %v236_v32, %v249_v33 }
 0x125   :  { %283 = vmatmul.f32.vlgmr.msra.gmra.mxu2 %v250_v34 }
 0x1a8   :  { %v284_v42 = vpop.f32.mrf.mxu2 }
 0x1a9   :  { %v294_v43 = vmul.f32 %v1169_v41, %v284_v42 }
 0x1ab   :  { %v295_v44 = vmul.f32 %v294_v43, %v294_v43 }
 0x1ad   :  { %v297_v45 = vrot.slane %v295_v44, 7 }
 0x1af   :  { %v299_v46 = vsub.f32 %v294_v43, %v297_v45 }
 0x1b1   :  { %v300_v47 = vmax.f32 %v299_v46, 0.0 }
 0x1b3   :  { %v302_v49 = vadd.f32 1e-05, %v300_v47 }
 0x1b5   :  { %981 = vrsqrt.f32 %v302_v49  ;;  %vm309_vm5 = vweird.f32 %v302_v49 }
 0x1bb   :  { %v982_v55 = vpop.eup %981 }
 0x1bc   :  { %v304_v57 = vmul.f32 %v982_v55, %v302_v49  ;;  %vm310_vm4 = vweird.f32 %v982_v55 }
 0x1bd   :  { %vm311_vm6 = vmor %vm309_vm5, %vm310_vm4 }
 0x1be   :  { %v305_v58 = vmul.f32 %v982_v55, %v304_v57 }
 0x1c0   :  { %v306_v62 = vmul.f32 0.5, %v305_v58 }
 0x1c2   :  { %v307_v63 = vsub.f32 1.5, %v306_v62 }
 0x1c4   :  { %v308_v3 = vmul.f32 %v982_v55, %v307_v63 }
 0x1c6   :  { %v312_v4 = vsel %vm311_vm6, %v982_v55, %v308_v3 }
 0x1c7   :  { %314 = vst [vmem:[#allocation1] sm:$0xff] %v312_v4 }
 0x1ce   :  { %v316_v12 = vld [vmem:[#allocation1 + $0x1] ss:$9 sm:$0xff] }
 0x1cf   :  { %v318_v13 = vmul.f32 %v316_v12, %v301_v11 }
 0x1d1   :  { %v320_v15 = vmul.f32 %v318_v13, %v294_v43 }
 0x1d3   :  { %v321_v16 = vsub.f32 %v319_v14, %v320_v15 }
 0x1d5   :  { %v323_v18 = vperm.slane %v321_v16, 0 }
 0x1d7   :  { %v325_v19 = vsel %vm41_vm2, %v318_v13, %v323_v18 }
 0x1d8   :  { %818 = vmatmul.msk.f32.vlgmr.msra.gmra.mxu3 %vm327_vm7, %v325_v19 }
 0x1d9   :  { %741 = vmatpush.msra.mxu3 %v1175_v48 }
 0x25b   :  { %v348_v29 = vpop.f32.mrf.mxu3 }
 0x25c   :  { %v351_v30 = vperm.slane %v348_v29, 0  ;;  %v356_v33 = vperm.slane %v348_v29, 1 }
 0x25e   :  { %v352_v31 = vmul.f32 %v351_v30, %v1150_v7  ;;  %v353_v32 = vmul.f32 %v351_v30, %v1148_v6  ;;  %v354_v38 = vmul.f32 %v351_v30, %v1152_v8  ;;  %v355_v39 = vmul.f32 %v351_v30, %v1163_v17 }
 0x260   :  { %v357_v34 = vadd.f32 %v356_v33, %v352_v31  ;;  %v358_v35 = vadd.f32 %v356_v33, %v353_v32  ;;  %v359_v48 = vadd.f32 %v356_v33, %v354_v38  ;;  %v360_v49 = vadd.f32 %v356_v33, %v355_v39 }
 0x262   :  { %v361_v36 = vmax.f32 %v357_v34, 0.0  ;;  %v362_v37 = vmax.f32 %v358_v35, 0.0  ;;  %v363_v50 = vmax.f32 %v359_v48, 0.0  ;;  %v364_v51 = vmax.f32 %v360_v49, 0.0 }
 0x264   :  { %v394_v40 = vpack.c.bf16 %v362_v37, %v361_v36  ;;  %v369_v42 = vrot.slane %v361_v36, 7  ;;  %v370_v43 = vrot.slane %v362_v37, 7  ;;  %v381_v44 = vrot.slane %v361_v36, 1 }
 0x265   :  { %v382_v45 = vrot.slane %v362_v37, 1  ;;  %v372_v52 = vrot.slane %v363_v50, 7  ;;  %v373_v53 = vrot.slane %v364_v51, 7  ;;  %v384_v54 = vrot.slane %v363_v50, 1 }
 0x266   :  { %618 = vmatmul.bf16.vlgmr.msrb.gmra.mxu1 %v394_v40  ;;  %v371_v7 = vsel %vm41_vm2, %v369_v42, %v370_v43  ;;  %v385_v55 = vrot.slane %v364_v51, 1  ;;  %v397_v56 = vpack.c.bf16 %v364_v51, %v363_v50 }
 0x267   :  { %v917_v46 = vpack.c.bf16 %v371_v7, %v369_v42  ;;  %v383_v47 = vsel %vm54_vm0, %v381_v44, %v382_v45  ;;  %v374_v57 = vsel %vm41_vm2, %v372_v52, %v373_v53 }
 0x268   :  { %v924_v17 = vpack.c.bf16 %v382_v45, %v383_v47  ;;  %v386_v58 = vsel %vm54_vm0, %v384_v54, %v385_v55  ;;  %v921_v59 = vpack.c.bf16 %v374_v57, %v372_v52  ;;  %v716_v57 = vld [vmem:[%s1333_s6] sm:$0x1] }
 0x269   :  { %918 = vmatmul.msk.bf16.vlgmr.msrb.gmra.mxu3 %vm1265_vm10, %v917_v46  ;;  %v927_v60 = vpack.c.bf16 %v385_v55, %v386_v58 }
 0x26a   :  { %925 = vmatmul.msk.bf16.vlgmr.msrb.gmra.mxu0 %vm1271_vm11, %v924_v17 }
 0x276   :  { %623 = vmatmul.bf16.gmra.mxu1 %v397_v56 }
 0x279   :  { %922 = vmatmul.msk.bf16.gmra.mxu3 %vm1265_vm10, %v921_v59 }
 0x27a   :  { %928 = vmatmul.msk.bf16.gmra.mxu0 %vm1271_vm11, %v927_v60 }
 0x2e3   :  { %v619_v61 = vpop.f32.mrf.mxu1 }
 0x2e7   :  { %v638_v62 = vpop.f32.mrf.mxu0 }
 0x2eb   :  { %v621_v0 = vpop.f32.mrf.mxu1 }
 0x2ec   :  { %v600_v63 = vpop.f32.mrf.mxu3 }
 0x2ed   :  { %v620_v10 = vadd.f32 %v619_v61, %v600_v63 }
 0x2ef   :  { %v640_v1 = vpop.f32.mrf.mxu0  ;;  %v1287_v13 = vadd.f32 %v638_v62, %v620_v10 }
 0x2f1   :  { %v657_v19 = vmul.f32 %v1287_v13, %v1287_v13 }
 0x2f3   :  { %v624_v3 = vpop.f32.mrf.mxu1 }
 0x2f4   :  { %v602_v2 = vpop.f32.mrf.mxu3 }
 0x2f5   :  { %v622_v4 = vadd.f32 %v621_v0, %v602_v2 }
 0x2f7   :  { %v643_v5 = vpop.f32.mrf.mxu0  ;;  %v1285_v12 = vadd.f32 %v640_v1, %v622_v4 }
 0x2f9   :  { %v658_v15 = vmul.f32 %v1285_v12, %v1285_v12  ;;  %v648_v20 = vadd.f32 %v1285_v12, %v1287_v13 }
 0x2fb   :  { %v626_v16 = vpop.f32.mrf.mxu1  ;;  %v661_v24 = vadd.f32 %v658_v15, %v657_v19 }
 0x2fc   :  { %v605_v9 = vpop.f32.mrf.mxu3 }
 0x2fd   :  { %v625_v11 = vadd.f32 %v624_v3, %v605_v9 }
 0x2ff   :  { %v1289_v14 = vadd.f32 %v643_v5, %v625_v11  ;;  %v645_v23 = vpop.f32.mrf.mxu0 }
 0x301   :  { %v659_v21 = vmul.f32 %v1289_v14, %v1289_v14  ;;  %v649_v25 = vadd.f32 %v648_v20, %v1289_v14 }
 0x303   :  { %v662_v27 = vadd.f32 %v661_v24, %v659_v21 }
 0x304   :  { %v607_v18 = vpop.f32.mrf.mxu3 }
 0x305   :  { %v627_v22 = vadd.f32 %v626_v16, %v607_v18 }
 0x307   :  { %v646_v26 = vadd.f32 %v645_v23, %v627_v22 }
 0x309   :  { %v650_v28 = vadd.f32 %v649_v25, %v646_v26  ;;  %v660_v29 = vmul.f32 %v646_v26, %v646_v26 }
 0x30b   :  { %v651_v30 = vrot.slane %v650_v28, 4  ;;  %v663_v31 = vadd.f32 %v662_v27, %v660_v29 }
 0x30d   :  { %v652_v32 = vadd.f32 %v651_v30, %v650_v28  ;;  %v664_v33 = vrot.slane %v663_v31, 4 }
 0x30f   :  { %v653_v34 = vrot.slane %v652_v32, 2  ;;  %v665_v35 = vadd.f32 %v664_v33, %v663_v31 }
 0x311   :  { %v654_v36 = vadd.f32 %v653_v34, %v652_v32  ;;  %v666_v37 = vrot.slane %v665_v35, 2 }
 0x313   :  { %v655_v38 = vrot.slane %v654_v36, 1  ;;  %v667_v39 = vadd.f32 %v666_v37, %v665_v35 }
 0x315   :  { %v668_v40 = vrot.slane %v667_v39, 1  ;;  %v656_v42 = vadd.f32 %v655_v38, %v654_v36 }
 0x317   :  { %v669_v43 = vadd.f32 %v668_v40, %v667_v39 }
 0x319   :  { %v670_v44 = vsel %vm41_vm2, %v656_v42, %v669_v43 }
 0x31a   :  { %687 = vmatmul.f32.vlgmr.msrb.gmra.mxu2 %v670_v44 }
 0x39d   :  { %v688_v45 = vpop.f32.mrf.mxu2 }
 0x39e   :  { %v691_v7 = vmul.f32 %v688_v45, %v1169_v41  ;;  %v698_v41 = vld [vmem:[%s1332_s5] sm:$0x1] }
 0x3a0   :  { %v692_v6 = vmul.f32 %v691_v7, %v691_v7 }
 0x3a2   :  { %v694_v46 = vrot.slane %v692_v6, 7 }
 0x3a4   :  { %v696_v47 = vsub.f32 %v691_v7, %v694_v46 }
 0x3a6   :  { %v697_v8 = vmax.f32 %v696_v47, 0.0 }
 0x3a8   :  { %v699_v17 = vadd.f32 1e-05, %v697_v8 }
 0x3aa   :  { %983 = vrsqrt.f32 %v699_v17  ;;  %vm706_vm13 = vweird.f32 %v699_v17 }
 0x3b0   :  { %v984_v48 = vpop.eup %983 }
 0x3b1   :  { %v701_v49 = vmul.f32 %v984_v48, %v699_v17  ;;  %vm707_vm12 = vweird.f32 %v984_v48 }
 0x3b2   :  { %vm708_vm14 = vmor %vm706_vm13, %vm707_vm12 }
 0x3b3   :  { %v702_v50 = vmul.f32 %v984_v48, %v701_v49 }
 0x3b5   :  { %v703_v51 = vmul.f32 0.5, %v702_v50 }
 0x3b7   :  { %v704_v52 = vsub.f32 1.5, %v703_v51 }
 0x3b9   :  { %v705_v53 = vmul.f32 %v984_v48, %v704_v52 }
 0x3bb   :  { %v709_v54 = vsel %vm708_vm14, %v984_v48, %v705_v53 }
 0x3bc   :  { %711 = vst [vmem:[#allocation1] sm:$0xff] %v709_v54 }
 0x3c3   :  { %v713_v55 = vld [vmem:[#allocation1 + $0x1] ss:$9 sm:$0xff] }
 0x3c4   :  { %v715_v56 = vmul.f32 %v713_v55, %v698_v41 }
 0x3c6   :  { %v717_v58 = vmul.f32 %v715_v56, %v691_v7 }
 0x3c8   :  { %v718_v59 = vsub.f32 %v716_v57, %v717_v58 }
 0x3ca   :  { %v720_v60 = vperm.slane %v718_v59, 0 }
 0x3cc   :  { %v722_v61 = vsel %vm41_vm2, %v715_v56, %v720_v60 }
 0x3cd   :  { %929 = vmatmul.msk.f32.vlgmr.msra.gmra.mxu3 %vm327_vm7, %v722_v61 }
 0x450   :  { %v743_v62 = vpop.f32.mrf.mxu3 }
 0x451   :  { %v746_v63 = vperm.slane %v743_v62, 0  ;;  %v751_v0 = vperm.slane %v743_v62, 1 }
 0x453   :  { %v747_v1 = vmul.f32 %v746_v63, %v1287_v13  ;;  %v748_v2 = vmul.f32 %v746_v63, %v1285_v12  ;;  %v749_v3 = vmul.f32 %v746_v63, %v1289_v14  ;;  %v750_v4 = vmul.f32 %v746_v63, %v646_v26 }
 0x455   :  { %v752_v5 = vadd.f32 %v751_v0, %v747_v1  ;;  %v753_v9 = vadd.f32 %v751_v0, %v748_v2  ;;  %v754_v10 = vadd.f32 %v751_v0, %v749_v3  ;;  %v755_v11 = vadd.f32 %v751_v0, %v750_v4 }
 0x457   :  { %v756_v15 = vmax.f32 %v752_v5, 0.0  ;;  %v757_v16 = vmax.f32 %v753_v9, 0.0  ;;  %v758_v18 = vmax.f32 %v754_v10, 0.0  ;;  %v759_v19 = vmax.f32 %v755_v11, 0.0 }
 0x459   :  { %760 = vst [vmem:[%s1334_s9] sm:$0xff] %v756_v15 }
 0x45a   :  { %761 = vst [vmem:[%s1334_s9 + $0x8] sm:$0xff] %v757_v16 }
 0x45b   :  { %762 = vst [vmem:[%s1334_s9 + $0x10] sm:$0xff] %v758_v18 }
 0x45c   :  { %763 = vst [vmem:[%s1334_s9 + $0x18] sm:$0xff] %v759_v19 }

</bundles_post_ra>
